<compile_context>
chip_gen: v7x
topology: tpu7x:2x2x1
jax: 0.10.0
libtpu: 0.0.40
codegen_flags: <defaults>
</compile_context>

<pallas_src>
import functools

import jax
import jax.numpy as jnp
import numpy as np
from jax import lax
from jax.experimental import pallas as pl
from jax.experimental.pallas import tpu as pltpu


def _conv_kernel(x_ref, w_ref, b_ref, e_ref, m_ref, o_ref, *, k, pad, H, Bblk, relu):
    # x_ref : (Bblk, H, W*Cin)       unpadded, row-flattened NHWC image (bf16)
    # w_ref : (k*W*Cin, W*Cout)      banded tap weights, VMEM-resident (bf16)
    # b_ref : (1, W*Cout)            bias tiled along W (f32)
    # e_ref : (W, W*Cout)            one-hot lane-expansion for the mask (f32)
    # m_ref : (Bblk, H, W)           spatial mask, un-expanded (f32)
    # o_ref : (Bblk, H, W*Cout)      output block, lane-dense last dim (=128)
    WCin = x_ref.shape[-1]

    # Tap-concatenated LHS:  X[b*H + h, dy*WCin + j] = x[b, h + dy - pad, j]
    # (zero when the source row falls outside [0, H)).  Static bf16 row shifts.
    xcats = []
    for b in range(Bblk):
        xb = x_ref[b]                                     # (H, W*Cin) bf16
        parts = []
        for dy in range(k):
            s = dy - pad
            if s == 0:
                parts.append(xb)
            elif s < 0:
                z = jnp.zeros((-s, WCin), xb.dtype)
                parts.append(jnp.concatenate([z, xb[:H + s]], axis=0))
            else:
                z = jnp.zeros((s, WCin), xb.dtype)
                parts.append(jnp.concatenate([xb[s:], z], axis=0))
        xcats.append(jnp.concatenate(parts, axis=-1))     # (H, k*W*Cin)
    x_cat = xcats[0] if Bblk == 1 else jnp.concatenate(xcats, axis=0)

    # Single MXU contraction over (dy, dx, Cin):
    #   (Bblk*H, k*W*Cin) @ (k*W*Cin, W*Cout) -> f32
    y = jnp.dot(x_cat, w_ref[...], preferred_element_type=jnp.float32)

    # Broadcast the (rows, W) mask across the Cout lanes via a one-hot matmul.
    m2 = m_ref[0] if Bblk == 1 else jnp.concatenate(
        [m_ref[b] for b in range(Bblk)], axis=0)          # (Bblk*H, W) f32
    m_exp = jnp.dot(m2, e_ref[...], preferred_element_type=jnp.float32)

    # Fused epilogue: bias + mask + ReLU, all f32, lane-dense 128-wide stores.
    y = (y + b_ref[...]) * m_exp
    if relu:
        y = jnp.maximum(y, 0.0)
    y = y.astype(o_ref.dtype)
    for b in range(Bblk):
        o_ref[b] = y[b * H:(b + 1) * H]


def _multi_tensorcore_chip():
    # v7x (and v4-class megacore chips) have >1 TensorCore per chip: keep the
    # batch-parallel grid there.  v5e / v6e are single-TC -> collapse the grid.
    try:
        kind = jax.devices()[0].device_kind.lower()
    except Exception:
        return False
    return ("v7" in kind) or ("v4" in kind)


def convolve_pallas(x_nchw, mask_nchw, weight, bias, *, relu=True,
                    compute_dtype=jnp.bfloat16, batch_parallel=None):
    """Forward of Convolve: relu(conv2d_same(x) + bias) * mask  (ReLU optional).

    x_nchw   : (B, Cin, H, W)
    mask_nchw: (B, 1, H, W)   (spatial mask, broadcast over channels)
    weight   : (Cout, Cin, k, k)   torch Conv2d layout
    bias     : (Cout,)
    returns  : (B, Cout, H, W)
    """
    B, Cin, H, W = x_nchw.shape
    Cout, _, k, _ = weight.shape
    assert k % 2 == 1, "padding='same' with even kernel not supported here"
    pad = k // 2
    WCin, WCout = W * Cin, W * Cout

    if batch_parallel is None:
        batch_parallel = _multi_tensorcore_chip()
    Bblk = 1 if (batch_parallel and B > 1) else B      # batches per grid step
    G = B // Bblk                                      # grid size

    # ---- glue (pure layout, no FLOPs; no pad, no mask expansion) ------------
    x_flat = jnp.transpose(x_nchw, (0, 2, 3, 1)).reshape(B, H, WCin)
    x_flat = x_flat.astype(compute_dtype)                            # (B,H,W*Cin)
    m2d = mask_nchw.reshape(B, H, W).astype(jnp.float32)             # (B,H,W)

    # Banded weight over *unpadded* input columns:
    #   w_band[(dy*W+p)*Cin+c, w*Cout+o] = weight[o, c, dy, p-w+pad]
    #   for 0 <= p-w+pad < k (taps off the board contribute zero).
    w_t = jnp.transpose(weight, (2, 3, 1, 0))                        # (k,k,Cin,Cout)
    sel = (jnp.arange(W)[None, None, :] ==
           (jnp.arange(W)[None, :, None] + jnp.arange(k)[:, None, None] - pad))
    sel = sel.astype(weight.dtype)                                   # (k_dx, W, P)
    w_band = jnp.einsum('xwp,yxco->ypcwo', sel, w_t)                 # (k,P,Cin,W,Cout)
    w_band = w_band.reshape(k * WCin, WCout).astype(compute_dtype)

    b_tiled = jnp.tile(bias.astype(jnp.float32), W).reshape(1, WCout)

    # One-hot lane expansion for the mask: E[w, w*Cout + o] = 1.
    e = (jnp.arange(WCout)[None, :] // Cout ==
         jnp.arange(W)[:, None]).astype(jnp.float32)                 # (W, W*Cout)

    # ---- Pallas kernel: one banded matmul + fused bias/mask/ReLU ------------
    grid_spec = pltpu.PrefetchScalarGridSpec(
        num_scalar_prefetch=0,
        grid=(G,),
        in_specs=[
            pl.BlockSpec((Bblk, H, WCin), lambda g: (g, 0, 0)),      # per-step image
            pl.BlockSpec((k * WCin, WCout), lambda g: (0, 0)),       # resident band
            pl.BlockSpec((1, WCout), lambda g: (0, 0)),              # resident bias
            pl.BlockSpec((W, WCout), lambda g: (0, 0)),              # resident one-hot
            pl.BlockSpec((Bblk, H, W), lambda g: (g, 0, 0)),         # per-step mask
        ],
        out_specs=pl.BlockSpec((Bblk, H, WCout), lambda g: (g, 0, 0)),
    )

    out = pl.pallas_call(
        functools.partial(_conv_kernel, k=k, pad=pad, H=H, Bblk=Bblk, relu=relu),
        out_shape=jax.ShapeDtypeStruct((B, H, WCout), x_nchw.dtype),
        grid_spec=grid_spec,
        compiler_params=pltpu.CompilerParams(
            dimension_semantics=("parallel",) if G > 1 else ("arbitrary",),
        ),
    )(x_flat, w_band, b_tiled, e, m2d)

    # (B, H, W*Cout) -> NCHW (module interface layout).
    return jnp.transpose(out.reshape(B, H, W, Cout), (0, 3, 1, 2))


def _reference(x_nchw, mask_nchw, weight, bias, *, relu=True):
    y = lax.conv_general_dilated(
        x_nchw, weight,
        window_strides=(1, 1),
        padding="SAME",
        dimension_numbers=("NCHW", "OIHW", "NCHW"),
    ) + bias[None, :, None, None]
    y = y * mask_nchw
    return jnp.maximum(y, 0.0) if relu else y


if __name__ == "__main__":
    # Small board-like shapes consistent with the module.
    B, Cin, Cout, H, W, k = 2, 4, 8, 16, 16, 3

    key = jax.random.PRNGKey(0)
    kx, km, kw, kb = jax.random.split(key, 4)

    x = jax.random.normal(kx, (B, Cin, H, W), jnp.float32)
    # binary spatial mask, broadcast over channels (as in the torch forward)
    mask = (jax.random.uniform(km, (B, 1, H, W)) > 0.2).astype(jnp.float32)

    # xavier_normal_-style conv weight; small nonzero bias to exercise the
    # bias-before-mask path (module init is zeros, shapes identical).
    fan_in, fan_out = Cin * k * k, Cout * k * k
    std = float(np.sqrt(2.0 / (fan_in + fan_out)))
    weight = std * jax.random.normal(kw, (Cout, Cin, k, k), jnp.float32)
    bias = 0.1 * jax.random.normal(kb, (Cout,), jnp.float32)

    out = convolve_pallas(x, mask, weight, bias, relu=True)
    out = jax.block_until_ready(out)

    ref = _reference(x, mask, weight, bias, relu=True)
    # bf16 matmul operands (f32 accumulation) vs. full-f32 reference.
    np.testing.assert_allclose(np.asarray(out), np.asarray(ref),
                               rtol=2e-2, atol=2e-2)

    print("KERNEL_OK")
</pallas_src>

<mosaic_0001>
module attributes {stable_mosaic.version = 11 : i64} {
  func.func @_conv_kernel(%arg0: i32, %arg1: memref<2x16x64xbf16, #tpu.memory_space<vmem>>, %arg2: memref<192x128xbf16, #tpu.memory_space<vmem>>, %arg3: memref<1x128xf32, #tpu.memory_space<vmem>>, %arg4: memref<16x128xf32, #tpu.memory_space<vmem>>, %arg5: memref<2x16x16xf32, #tpu.memory_space<vmem>>, %arg6: memref<2x16x128xf32, #tpu.memory_space<vmem>>) attributes {dimension_semantics = [#tpu.dimension_semantics<arbitrary>], iteration_bounds = array<i64: 1>, scalar_prefetch = 0 : i64, scratch_operands = 0 : i64, tpu.core_type = #tpu.core_type<tc>, window_params = [{transform_indices = @transform_0, window_bounds = array<i64: 2, 16, 64>}, {pipeline_mode = #tpu.pipeline_mode<synchronous>, transform_indices = @transform_1, window_bounds = array<i64: 192, 128>}, {pipeline_mode = #tpu.pipeline_mode<synchronous>, transform_indices = @transform_2, window_bounds = array<i64: 1, 128>}, {pipeline_mode = #tpu.pipeline_mode<synchronous>, transform_indices = @transform_3, window_bounds = array<i64: 16, 128>}, {transform_indices = @transform_4, window_bounds = array<i64: 2, 16, 16>}, {transform_indices = @transform_5, window_bounds = array<i64: 2, 16, 128>}]} {
    %c0 = arith.constant 0 : index
    %c0_0 = arith.constant 0 : index
    %c0_1 = arith.constant 0 : index
    %0 = vector.load %arg1[%c0, %c0_0, %c0_1] : memref<2x16x64xbf16, #tpu.memory_space<vmem>>, vector<1x16x64xbf16>
    %1 = vector.shape_cast %0 : vector<1x16x64xbf16> to vector<16x64xbf16>
    %cst = arith.constant 0.000000e+00 : bf16
    %2 = vector.broadcast %cst : bf16 to vector<1x64xbf16>
    %3 = vector.extract_strided_slice %1 {offsets = [0, 0], sizes = [15, 64], strides = [1, 1]} : vector<16x64xbf16> to vector<15x64xbf16>
    %4 = tpu.concatenate %2, %3 in 0 : vector<1x64xbf16>, vector<15x64xbf16> -> vector<16x64xbf16>
    %cst_2 = arith.constant 0.000000e+00 : bf16
    %5 = vector.broadcast %cst_2 : bf16 to vector<1x64xbf16>
    %6 = vector.extract_strided_slice %1 {offsets = [1, 0], sizes = [15, 64], strides = [1, 1]} : vector<16x64xbf16> to vector<15x64xbf16>
    %7 = tpu.concatenate %6, %5 in 0 : vector<15x64xbf16>, vector<1x64xbf16> -> vector<16x64xbf16>
    %8 = tpu.concatenate %4, %1, %7 in 1 : vector<16x64xbf16>, vector<16x64xbf16>, vector<16x64xbf16> -> vector<16x192xbf16>
    %c1 = arith.constant 1 : index
    %c0_3 = arith.constant 0 : index
    %c0_4 = arith.constant 0 : index
    %9 = vector.load %arg1[%c1, %c0_3, %c0_4] : memref<2x16x64xbf16, #tpu.memory_space<vmem>>, vector<1x16x64xbf16>
    %10 = vector.shape_cast %9 : vector<1x16x64xbf16> to vector<16x64xbf16>
    %cst_5 = arith.constant 0.000000e+00 : bf16
    %11 = vector.broadcast %cst_5 : bf16 to vector<1x64xbf16>
    %12 = vector.extract_strided_slice %10 {offsets = [0, 0], sizes = [15, 64], strides = [1, 1]} : vector<16x64xbf16> to vector<15x64xbf16>
    %13 = tpu.concatenate %11, %12 in 0 : vector<1x64xbf16>, vector<15x64xbf16> -> vector<16x64xbf16>
    %cst_6 = arith.constant 0.000000e+00 : bf16
    %14 = vector.broadcast %cst_6 : bf16 to vector<1x64xbf16>
    %15 = vector.extract_strided_slice %10 {offsets = [1, 0], sizes = [15, 64], strides = [1, 1]} : vector<16x64xbf16> to vector<15x64xbf16>
    %16 = tpu.concatenate %15, %14 in 0 : vector<15x64xbf16>, vector<1x64xbf16> -> vector<16x64xbf16>
    %17 = tpu.concatenate %13, %10, %16 in 1 : vector<16x64xbf16>, vector<16x64xbf16>, vector<16x64xbf16> -> vector<16x192xbf16>
    %18 = tpu.concatenate %8, %17 in 0 : vector<16x192xbf16>, vector<16x192xbf16> -> vector<32x192xbf16>
    %c0_7 = arith.constant 0 : index
    %c0_8 = arith.constant 0 : index
    %19 = vector.load %arg2[%c0_7, %c0_8] : memref<192x128xbf16, #tpu.memory_space<vmem>>, vector<192x128xbf16>
    %cst_9 = arith.constant dense<0.000000e+00> : vector<32x128xf32>
    %20 = tpu.matmul %18, %19, %cst_9 {dimension_numbers = #tpu.dot_dimension_numbers<[1], [0], [0], [1], [0, 0, 1, 1], [], []>} : vector<32x192xbf16>, vector<192x128xbf16>, vector<32x128xf32> -> vector<32x128xf32>
    %c0_10 = arith.constant 0 : index
    %c0_11 = arith.constant 0 : index
    %c0_12 = arith.constant 0 : index
    %21 = vector.load %arg5[%c0_10, %c0_11, %c0_12] : memref<2x16x16xf32, #tpu.memory_space<vmem>>, vector<1x16x16xf32>
    %22 = vector.shape_cast %21 : vector<1x16x16xf32> to vector<16x16xf32>
    %c1_13 = arith.constant 1 : index
    %c0_14 = arith.constant 0 : index
    %c0_15 = arith.constant 0 : index
    %23 = vector.load %arg5[%c1_13, %c0_14, %c0_15] : memref<2x16x16xf32, #tpu.memory_space<vmem>>, vector<1x16x16xf32>
    %24 = vector.shape_cast %23 : vector<1x16x16xf32> to vector<16x16xf32>
    %25 = tpu.concatenate %22, %24 in 0 : vector<16x16xf32>, vector<16x16xf32> -> vector<32x16xf32>
    %c0_16 = arith.constant 0 : index
    %c0_17 = arith.constant 0 : index
    %26 = vector.load %arg4[%c0_16, %c0_17] : memref<16x128xf32, #tpu.memory_space<vmem>>, vector<16x128xf32>
    %cst_18 = arith.constant dense<0.000000e+00> : vector<32x128xf32>
    %27 = tpu.matmul %25, %26, %cst_18 {dimension_numbers = #tpu.dot_dimension_numbers<[1], [0], [0], [1], [0, 0, 1, 1], [], []>} : vector<32x16xf32>, vector<16x128xf32>, vector<32x128xf32> -> vector<32x128xf32>
    %c0_19 = arith.constant 0 : index
    %c0_20 = arith.constant 0 : index
    %28 = vector.load %arg3[%c0_19, %c0_20] : memref<1x128xf32, #tpu.memory_space<vmem>>, vector<1x128xf32>
    %29 = vector.broadcast %28 : vector<1x128xf32> to vector<32x128xf32>
    %30 = arith.addf %20, %29 : vector<32x128xf32>
    %31 = arith.mulf %30, %27 : vector<32x128xf32>
    %cst_21 = arith.constant 0.000000e+00 : f32
    %32 = vector.broadcast %cst_21 : f32 to vector<32x128xf32>
    %33 = arith.maximumf %31, %32 : vector<32x128xf32>
    %34 = vector.extract_strided_slice %33 {offsets = [0, 0], sizes = [16, 128], strides = [1, 1]} : vector<32x128xf32> to vector<16x128xf32>
    %c0_22 = arith.constant 0 : index
    %c0_23 = arith.constant 0 : index
    %c0_24 = arith.constant 0 : index
    %35 = vector.load %arg6[%c0_22, %c0_23, %c0_24] : memref<2x16x128xf32, #tpu.memory_space<vmem>>, vector<1x16x128xf32>
    %36 = vector.shape_cast %35 : vector<1x16x128xf32> to vector<16x128xf32>
    %37 = vector.shape_cast %34 : vector<16x128xf32> to vector<1x16x128xf32>
    tpu.vector_store %arg6[%c0_22, %c0_23, %c0_24], %37 {strides = array<i32>} : memref<2x16x128xf32, #tpu.memory_space<vmem>>, vector<1x16x128xf32>,
    %38 = vector.extract_strided_slice %33 {offsets = [16, 0], sizes = [16, 128], strides = [1, 1]} : vector<32x128xf32> to vector<16x128xf32>
    %c1_25 = arith.constant 1 : index
    %c0_26 = arith.constant 0 : index
    %c0_27 = arith.constant 0 : index
    %39 = vector.load %arg6[%c1_25, %c0_26, %c0_27] : memref<2x16x128xf32, #tpu.memory_space<vmem>>, vector<1x16x128xf32>
    %40 = vector.shape_cast %39 : vector<1x16x128xf32> to vector<16x128xf32>
    %41 = vector.shape_cast %38 : vector<16x128xf32> to vector<1x16x128xf32>
    tpu.vector_store %arg6[%c1_25, %c0_26, %c0_27], %41 {strides = array<i32>} : memref<2x16x128xf32, #tpu.memory_space<vmem>>, vector<1x16x128xf32>,
    return
  }
  func.func @transform_0(%arg0: i32) -> (i32, i32, i32) {
    %c0_i32 = arith.constant 0 : i32
    %c0_i32_0 = arith.constant 0 : i32
    %c0_i32_1 = arith.constant 0 : i32
    return %arg0, %c0_i32, %c0_i32_0 : i32, i32, i32
  }
  func.func @transform_1(%arg0: i32) -> (i32, i32) {
    %c0_i32 = arith.constant 0 : i32
    %c0_i32_0 = arith.constant 0 : i32
    %c0_i32_1 = arith.constant 0 : i32
    return %c0_i32, %c0_i32_0 : i32, i32
  }
  func.func @transform_2(%arg0: i32) -> (i32, i32) {
    %c0_i32 = arith.constant 0 : i32
    %c0_i32_0 = arith.constant 0 : i32
    %c0_i32_1 = arith.constant 0 : i32
    return %c0_i32, %c0_i32_0 : i32, i32
  }
  func.func @transform_3(%arg0: i32) -> (i32, i32) {
    %c0_i32 = arith.constant 0 : i32
    %c0_i32_0 = arith.constant 0 : i32
    %c0_i32_1 = arith.constant 0 : i32
    return %c0_i32, %c0_i32_0 : i32, i32
  }
  func.func @transform_4(%arg0: i32) -> (i32, i32, i32) {
    %c0_i32 = arith.constant 0 : i32
    %c0_i32_0 = arith.constant 0 : i32
    %c0_i32_1 = arith.constant 0 : i32
    return %arg0, %c0_i32, %c0_i32_0 : i32, i32, i32
  }
  func.func @transform_5(%arg0: i32) -> (i32, i32, i32) {
    %c0_i32 = arith.constant 0 : i32
    %c0_i32_0 = arith.constant 0 : i32
    %c0_i32_1 = arith.constant 0 : i32
    return %arg0, %c0_i32, %c0_i32_0 : i32, i32, i32
  }
}

</mosaic_0001>

<bundles_post_ra>
// kernel: tpu_custom_call.1
= control target key start
LH: loop header
LB: loop body
LE: loop exit
PB: predicated region body
PF: predicated region fallthrough
CT: control target
= control target key end

     0   :  { %10 = vsyncpa [#allocation3], 0  ;;  %s810_s0 = inlined_call_operand.hbm [shape: bf16[2,16,64], index: 0, kind: input, shape index: {}]   ;;  %s811_s1 = inlined_call_operand.hbm [shape: bf16[192,128], index: 1, kind: input, shape index: {}]   ;;  %s812_s2 = inlined_call_operand.vmem [shape: f32[1,128], index: 2, kind: input, shape index: {}]   ;;  %s813_s3 = inlined_call_operand.hbm [shape: f32[16,128], index: 3, kind: input, shape index: {}]   ;;  %s814_s4 = inlined_call_operand.hbm [shape: f32[2,16,16], index: 4, kind: input, shape index: {}]   ;;  %s815_s5 = inlined_call_operand.hbm [shape: f32[2,16,128], index: 5, kind: output, shape index: {}]  }
   0x1   :  { %11 = vsyncpa [#allocation6], 0 }
   0x2   :  { %12 = vsyncpa [#allocation9], 0 }
   0x3   :  { %13 = vsyncpa [#allocation4], 0  ;;  %s639_s18 = smov [#allocation5]   ;;  %s640_s20 = smov [#allocation2]  }
   0x4   :  { %s31_s19 = sshll.u32 %s639_s18, 4  ;;  %s19_s21 = sshll.u32 %s640_s20, 4  ;;  %s32_s19 = int_to_ptr.vmem [resolvable:$true] %s31_s19  ;;  %s679_s21 = int_to_ptr.vmem [resolvable:$true] %s19_s21 }
   0x5   :  { %s521_s24 = scalar_lea.hbm %s811_s1, 1536 }
   0x6   :  { %p522_p0 = scmp.ne.s32.totalorder %s811_s1, %s521_s24  ;;  %p525_p1 = scmp.lt.u32.totalorder %s521_s24, %s811_s1 }
   0x8   :  { %p527_p2 = pnand %p525_p1, %p522_p0 }
   0xa   :  { %530 = shalt.err (!%p527_p2)
}
   0xb   :  { %s531_s29 = scalar_lea.vmem %s32_s19, 1536  ;;  %p536_p4 = scmp.lt.s32.totalorder %s32_s19, %s32_s19 }
   0xc   :  { %p532_p3 = scmp.ne.s32.totalorder %s32_s19, %s531_s29  ;;  %p537_p5 = scmp.lt.s32.totalorder %s531_s29, %s531_s29 }
   0xe   :  { %p538_p6 = por %p537_p5, %p536_p4 }
  0x10   :  { %p539_p7 = pnand %p538_p6, %p532_p3 }
  0x12   :  { %542 = shalt.err (!%p539_p7)
}
  0x13   :  { %s641_s30 = smov 64   ;;  %s642_s6 = smov 4  }
  0x14   :  { %37 = dma.hbm_to_vmem [thread:$0]  %s811_s1, 1536, %s32_s19, [#allocation6], %s641_s30, %s641_s30, %s642_s6  }
  0x15   :  { %s543_s11 = scalar_lea.hbm %s810_s0, 256 }
  0x16   :  { %p544_p8 = scmp.ne.s32.totalorder %s810_s0, %s543_s11  ;;  %p547_p9 = scmp.lt.u32.totalorder %s543_s11, %s810_s0 }
  0x18   :  { %p549_p10 = pnand %p547_p9, %p544_p8 }
  0x1a   :  { %552 = shalt.err (!%p549_p10)
}
  0x1b   :  { %s553_s16 = scalar_lea.vmem %s679_s21, 256  ;;  %p558_p12 = scmp.lt.s32.totalorder %s679_s21, %s679_s21 }
  0x1c   :  { %p554_p11 = scmp.ne.s32.totalorder %s679_s21, %s553_s16  ;;  %p559_p13 = scmp.lt.s32.totalorder %s553_s16, %s553_s16 }
  0x1e   :  { %p560_p0 = por %p559_p13, %p558_p12 }
  0x20   :  { %p561_p1 = pnand %p560_p0, %p554_p11 }
  0x22   :  { %564 = shalt.err (!%p561_p1)
}
  0x23   :  { %25 = dma.hbm_to_vmem [thread:$0]  %s810_s0, 256, %s679_s21, [#allocation3], %s641_s30, %s641_s30, %s642_s6  }
  0x24   :  { %s643_s18 = smov [#allocation7]   ;;  %s565_s23 = scalar_lea.hbm %s813_s3, 256 }
  0x25   :  { %s45_s19 = sshll.u32 %s643_s18, 4  ;;  %p566_p2 = scmp.ne.s32.totalorder %s813_s3, %s565_s23  ;;  %s46_s19 = int_to_ptr.vmem [resolvable:$true] %s45_s19 }
  0x26   :  { %p569_p3 = scmp.lt.u32.totalorder %s565_s23, %s813_s3 }
  0x28   :  { %p571_p4 = pnand %p569_p3, %p566_p2 }
  0x2a   :  { %574 = shalt.err (!%p571_p4)
}
  0x2b   :  { %s575_s28 = scalar_lea.vmem %s46_s19, 256  ;;  %p580_p6 = scmp.lt.s32.totalorder %s46_s19, %s46_s19 }
  0x2c   :  { %p576_p5 = scmp.ne.s32.totalorder %s46_s19, %s575_s28  ;;  %p581_p7 = scmp.lt.s32.totalorder %s575_s28, %s575_s28 }
  0x2e   :  { %p582_p8 = por %p581_p7, %p580_p6 }
  0x30   :  { %p583_p9 = pnand %p582_p8, %p576_p5 }
  0x32   :  { %586 = shalt.err (!%p583_p9)
}
  0x33   :  { %s644_s0 = smov 128   ;;  %s645_s21 = smov 8  }
  0x34   :  { %51 = dma.hbm_to_vmem [thread:$0]  %s813_s3, 256, %s46_s19, [#allocation6], %s644_s0, %s644_s0, %s645_s21  }
  0x35   :  { %s646_s7 = smov [#allocation8]   ;;  %s587_s11 = scalar_lea.hbm %s814_s4, 512 }
  0x36   :  { %s57_s8 = sshll.u32 %s646_s7, 4  ;;  %p588_p10 = scmp.ne.s32.totalorder %s814_s4, %s587_s11  ;;  %s58_s8 = int_to_ptr.vmem [resolvable:$true] %s57_s8 }
  0x37   :  { %p591_p11 = scmp.lt.u32.totalorder %s587_s11, %s814_s4 }
  0x39   :  { %p593_p12 = pnand %p591_p11, %p588_p10 }
  0x3b   :  { %596 = shalt.err (!%p593_p12)
}
  0x3c   :  { %s597_s16 = scalar_lea.vmem %s58_s8, 512  ;;  %p602_p0 = scmp.lt.s32.totalorder %s58_s8, %s58_s8 }
  0x3d   :  { %p598_p13 = scmp.ne.s32.totalorder %s58_s8, %s597_s16  ;;  %p603_p1 = scmp.lt.s32.totalorder %s597_s16, %s597_s16 }
  0x3f   :  { %p604_p2 = por %p603_p1, %p602_p0 }
  0x41   :  { %p605_p3 = pnand %p604_p2, %p598_p13 }
  0x43   :  { %608 = shalt.err (!%p605_p3)
}
  0x44   :  { %63 = dma.hbm_to_vmem [thread:$0]  %s814_s4, 512, %s58_s8, [#allocation9], %s644_s0, %s644_s0, %s645_s21  }
  0x45   :  { %631 = dma.done.wait [#allocation3], 256  }
  0x46   :  { %632 = vsyncadd [#allocation3], 4294967040 }
  0x47   :  { %633 = dma.done.wait [#allocation6], 1792  }
  0x48   :  { %634 = vsyncadd [#allocation6], 4294965504 }
  0x49   :  { %635 = dma.done.wait [#allocation9], 512  }
  0x4a   :  { %636 = vsyncadd [#allocation9], 4294966784  ;;  %v647_v0 = vmov 0   ;;  %v507_v1 = vld [vmem:[#allocation2] sm:$0xff]   ;;  %vm168_vm0 = vcmask 130048   ;;  %v508_v2 = vld [vmem:[#allocation2 + $0x8] sm:$0xff]  }
  0x4b   :  { %473 = vmatprep.subr.bf16.mxu1 %v647_v0  ;;  %103 = vrot.lane.b32.xlu0 %v507_v1, %s641_s30  ;;  %v85_v3 = vshrl.u32 %v507_v1, 16  ;;  %v166_v4 = vld [vmem:[#allocation7] sm:$0xff]  ;;  %v167_v5 = vld [vmem:[#allocation7 + $0x8] sm:$0xff]  ;;  %v161_v6 = vld [vmem:[#allocation8] sm:$0xff]  ;;  %v88_v8 = vshll.u32 %v507_v1, 16  ;;  %v119_v9 = vshrl.u32 %v508_v2, 16 }
  0x4c   :  { %v469_v7 = vpack.c.bf16 %v167_v5, %v166_v4  ;;  %463 = vmatprep.mubr.msk.f32.mxu0 %vm168_vm0, %v161_v6  ;;  %v509_v11 = vld [vmem:[#allocation5] sm:$0xff]   ;;  %v162_v12 = vld [vmem:[#allocation8 + $0x8] sm:$0xff]  ;;  %v122_v16 = vshll.u32 %v508_v2, 16  ;;  %vm100_vm1 = vsmask.f32 7424  ;;  %v510_v17 = vld [vmem:[#allocation5 + $0x8] sm:$0xff]  }
  0x4d   :  { %v87_v10 = vrot.slane %v85_v3, 7  ;;  %v121_v14 = vrot.slane %v119_v9, 7  ;;  %485 = vmatpush1.bf16.msra.mxu1 %v509_v11  ;;  %v96_v15 = vrot.slane %v88_v8, 1  ;;  %vm99_vm2 = vcmask 1047552   ;;  %v511_v23 = vld [vmem:[#allocation5 + $0x10] sm:$0xff]   ;;  %v164_v24 = vld [vmem:[#allocation8 + $0x10] sm:$0xff] }
  0x4e   :  { %470 = vmatprep.subr.bf16.mxu0 %v469_v7  ;;  %474 = vmatprep.subr.bf16.mxu1 %v647_v0  ;;  %v127_v19 = vrot.slane %v122_v16, 1  ;;  %vm757_vm3 = vmand %vm99_vm2, %vm100_vm1  ;;  %v165_v25 = vld [vmem:[#allocation8 + $0x18] sm:$0xff]  ;;  %vm105_vm4 = vcmask 523264   ;;  %v512_v28 = vld [vmem:[#allocation5 + $0x18] sm:$0xff]   ;;  %vm92_vm5 = vcmask 1040384   ;;  %s648_s17 = smov [#allocation10]  }
  0x4f   :  { %131 = vrot.lane.b32.xlu0 %v508_v2, %s641_s30  ;;  %472 = vmatpush3.bf16.msra.mxu0 %v469_v7  ;;  %v748_v13 = vor.u32 %v88_v8, %v87_v10  ;;  %v753_v18 = vor.u32 %v122_v16, %v121_v14  ;;  %v97_v20 = vor.u32 %v96_v15, %v85_v3  ;;  %v513_v29 = vld [vmem:[#allocation5 + $0x20] sm:$0xff]   ;;  %v514_v30 = vld [vmem:[#allocation5 + $0x28] sm:$0xff]   ;;  %v515_v31 = vld [vmem:[#allocation5 + $0x30] sm:$0xff]   ;;  %vm93_vm6 = vsmask.f32 256 }
  0x50   :  { %351 = vmatprep.subr.bf16.mxu0 %v647_v0  ;;  %v128_v22 = vor.u32 %v127_v19, %v119_v9  ;;  %v516_v32 = vld [vmem:[#allocation5 + $0x38] sm:$0xff]   ;;  %v517_v33 = vld [vmem:[#allocation5 + $0x40] sm:$0xff]   ;;  %v518_v34 = vld [vmem:[#allocation5 + $0x48] sm:$0xff]  }
  0x51   :  { %486 = vmatpush1.bf16.msra.mxu1 %v510_v17  ;;  %v102_v27 = vsel %vm757_vm3, %v97_v20, 0  ;;  %v519_v35 = vld [vmem:[#allocation5 + $0x50] sm:$0xff]   ;;  %v520_v36 = vld [vmem:[#allocation5 + $0x58] sm:$0xff]   ;;  %vm94_vm7 = vmand %vm92_vm5, %vm93_vm6 }
  0x52   :  { %464 = vmatmul.mubr.msk.f32.vlgmr.msra.gmra.mrb[0].mxu0 %vm168_vm0, %v162_v12  ;;  %475 = vmatprep.subr.bf16.mxu1 %v647_v0  ;;  %v130_v26 = vsel %vm757_vm3, %v128_v22, 0  ;;  %v95_v37 = vsel %vm94_vm7, 0, %v748_v13  ;;  %v126_v40 = vsel %vm94_vm7, 0, %v753_v18  ;;  %v438_v47 = vld [vmem:[%s812_s2] ss:$0 sm:$0xff]  ;;  %s418_s2 = sshll.u32 %s648_s17, 4  ;;  %s419_s2 = int_to_ptr.vmem [resolvable:$true] %s418_s2 }
  0x53   :  { %352 = vmatpush1.bf16.msra.mxu0 %v509_v11  ;;  %466 = vmatprep.mubr.msk.f32.mxu0 %vm168_vm0, %v164_v24  ;;  %s609_s18 = scalar_lea.vmem %s419_s2, 512  ;;  %p614_p5 = scmp.lt.s32.totalorder %s419_s2, %s419_s2 }
  0x54   :  { %353 = vmatprep.subr.bf16.mxu0 %v647_v0  ;;  %452 = vmatprep.mubr.msk.bf16.mxu1 %vm105_vm4, %v130_v26  ;;  %p610_p4 = scmp.ne.s32.totalorder %s419_s2, %s609_s18  ;;  %p615_p6 = scmp.lt.s32.totalorder %s609_s18, %s609_s18 }
  0x55   :  { %487 = vmatpush1.bf16.msra.mxu1 %v511_v23 }
  0x56   :  { %476 = vmatprep.subr.bf16.mxu1 %v647_v0  ;;  %467 = vmatmul.mubr.msk.f32.gmra.mrb[2].mxu0 %vm168_vm0, %v165_v25  ;;  %p616_p7 = por %p615_p6, %p614_p5 }
  0x57   :  { %354 = vmatpush1.bf16.msra.mxu0 %v510_v17  ;;  %451 = vmatprep.mubr.msk.bf16.mxu0 %vm105_vm4, %v102_v27 }
  0x58   :  { %355 = vmatprep.subr.bf16.mxu0 %v647_v0  ;;  %p617_p8 = pnand %p616_p7, %p610_p4 }
  0x59   :  { %488 = vmatpush1.bf16.msra.mxu1 %v512_v28 }
  0x5a   :  { %477 = vmatprep.subr.bf16.mxu1 %v647_v0 }
  0x5b   :  { %356 = vmatpush1.bf16.msra.mxu0 %v511_v23 }
  0x5c   :  { %357 = vmatprep.subr.bf16.mxu0 %v647_v0 }
  0x5d   :  { %489 = vmatpush1.bf16.msra.mxu1 %v513_v29 }
  0x5e   :  { %478 = vmatprep.subr.bf16.mxu1 %v647_v0 }
  0x5f   :  { %358 = vmatpush1.bf16.msra.mxu0 %v512_v28 }
  0x60   :  { %359 = vmatprep.subr.bf16.mxu0 %v647_v0 }
  0x61   :  { %490 = vmatpush1.bf16.msra.mxu1 %v514_v30 }
  0x62   :  { %479 = vmatprep.subr.bf16.mxu1 %v647_v0 }
  0x63   :  { %360 = vmatpush1.bf16.msra.mxu0 %v513_v29 }
  0x64   :  { %361 = vmatprep.subr.bf16.mxu0 %v647_v0 }
  0x65   :  { %491 = vmatpush1.bf16.msra.mxu1 %v515_v31 }
  0x66   :  { %480 = vmatprep.subr.bf16.mxu1 %v647_v0 }
  0x67   :  { %362 = vmatpush1.bf16.msra.mxu0 %v514_v30 }
  0x68   :  { %363 = vmatprep.subr.bf16.mxu0 %v647_v0 }
  0x69   :  { %492 = vmatpush1.bf16.msra.mxu1 %v516_v32 }
  0x6a   :  { %481 = vmatprep.subr.bf16.mxu1 %v647_v0 }
  0x6b   :  { %364 = vmatpush1.bf16.msra.mxu0 %v515_v31 }
  0x6c   :  { %365 = vmatprep.subr.bf16.mxu0 %v647_v0 }
  0x6d   :  { %493 = vmatpush1.bf16.msra.mxu1 %v517_v33 }
  0x6e   :  { %482 = vmatprep.subr.bf16.mxu1 %v647_v0 }
  0x6f   :  { %366 = vmatpush1.bf16.msra.mxu0 %v516_v32 }
  0x70   :  { %367 = vmatprep.subr.bf16.mxu0 %v647_v0 }
  0x71   :  { %494 = vmatpush1.bf16.msra.mxu1 %v518_v34 }
  0x72   :  { %483 = vmatprep.subr.bf16.mxu1 %v647_v0 }
  0x73   :  { %368 = vmatpush1.bf16.msra.mxu0 %v517_v33 }
  0x74   :  { %369 = vmatprep.subr.bf16.mxu0 %v647_v0 }
  0x75   :  { %495 = vmatpush1.bf16.msra.mxu1 %v519_v35 }
  0x76   :  { %484 = vmatprep.subr.bf16.mxu1 %v647_v0 }
  0x77   :  { %370 = vmatpush1.bf16.msra.mxu0 %v518_v34 }
  0x78   :  { %371 = vmatprep.subr.bf16.mxu0 %v647_v0 }
  0x79   :  { %496 = vmatpush1.bf16.msra.mxu1 %v520_v36 }
  0x7b   :  { %372 = vmatpush1.bf16.msra.mxu0 %v519_v35 }
  0x7c   :  { %373 = vmatprep.subr.bf16.mxu0 %v647_v0 }
  0x7f   :  { %374 = vmatpush1.bf16.msra.mxu0 %v520_v36 }
  0xbd   :  { %v104_v38 = vpop.permute.xlu0 %103 }
  0xbe   :  { %v108_v39 = vsel %vm105_vm4, %v95_v37, %v104_v38 }
  0xbf   :  { %384 = vmatmul.mubr.bf16.vlgmr.msra.gmra.mrb[4].mxu0 %v108_v39 }
  0xc1   :  { %v132_v41 = vpop.permute.xlu0 %131 }
  0xc2   :  { %v135_v42 = vsel %vm105_vm4, %v126_v40, %v132_v41 }
  0xc3   :  { %392 = vmatmul.mubr.bf16.vlgmr.msra.gmra.mrb[0].mxu1 %v135_v42 }
 0x125   :  { %v465_v43 = vpop.f32.mrb[0].mxu0 }
 0x126   :  { %v247_v44 = vpop.f32.mrb[1].mxu0 }
 0x129   :  { %v468_v45 = vpop.f32.mrb[2].mxu0 }
 0x12a   :  { %v257_v46 = vpop.f32.mrb[3].mxu0 }
 0x192   :  { %v385_v48 = vpop.f32.mrb[4].mxu0 }
 0x193   :  { %v386_v49 = vadd.f32 %v438_v47, %v385_v48  ;;  %v387_v50 = vpop.f32.mrb[5].mxu0 }
 0x194   :  { %v388_v51 = vpop.f32.mrb[6].mxu0 }
 0x195   :  { %v400_v52 = vmul.f32 %v386_v49, %v247_v44  ;;  %v389_v53 = vadd.f32 %v438_v47, %v388_v51  ;;  %v390_v54 = vpop.f32.mrb[7].mxu0 }
 0x196   :  { %v393_v55 = vpop.f32.mrb[0].mxu1 }
 0x197   :  { %v404_v56 = vmax.f32 %v400_v52, 0.0  ;;  %v401_v57 = vmul.f32 %v465_v43, %v389_v53  ;;  %v394_v58 = vadd.f32 %v438_v47, %v393_v55  ;;  %v395_v59 = vpop.f32.mrb[1].mxu1 }
 0x198   :  { %v396_v60 = vpop.f32.mrb[2].mxu1 }
 0x199   :  { %408 = vst [vmem:[#allocation10] sm:$0xff] %v404_v56  ;;  %v405_v61 = vmax.f32 %v401_v57, 0.0  ;;  %v402_v62 = vmul.f32 %v394_v58, %v257_v46  ;;  %v397_v63 = vadd.f32 %v438_v47, %v396_v60  ;;  %v398_v0 = vpop.f32.mrb[3].mxu1 }
 0x19b   :  { %409 = vst [vmem:[#allocation10 + $0x8] sm:$0xff] %v405_v61  ;;  %v406_v1 = vmax.f32 %v402_v62, 0.0  ;;  %v403_v2 = vmul.f32 %v468_v45, %v397_v63 }
 0x19d   :  { %411 = vst [vmem:[#allocation10 + $0x10] sm:$0xff] %v406_v1  ;;  %v407_v3 = vmax.f32 %v403_v2, 0.0 }
 0x19f   :  { %412 = vst [vmem:[#allocation10 + $0x18] sm:$0xff] %v407_v3 }
 0x1a0   :  { %620 = shalt.err (!%p617_p8)
}
 0x1a1   :  { %s621_s22 = scalar_lea.hbm %s815_s5, 512 }
 0x1a2   :  { %p622_p9 = scmp.ne.s32.totalorder %s815_s5, %s621_s22  ;;  %p625_p10 = scmp.lt.u32.totalorder %s621_s22, %s815_s5 }
 0x1a4   :  { %p627_p11 = pnand %p625_p10, %p622_p9 }
 0x1a6   :  { %630 = shalt.err (!%p627_p11)
}
 0x1a7   :  { %424 = dma.vmem_to_hbm [thread:$0]  %s419_s2, 512, %s815_s5, [#allocation4], %s644_s0, %s644_s0, %s645_s21  }
 0x1a8   :  { %637 = dma.done.wait [#allocation4], 512  }
 0x1a9   :  { %638 = vsyncadd [#allocation4], 4294966784 }
 0x1aa   :  { %428 = vsyncpa [#allocation3], 1 }
 0x1ab   :  { %429 = vsyncpa [#allocation6], 1 }
 0x1ac   :  { %430 = vsyncpa [#allocation9], 1 }
 0x1ad   :  { %431 = vsyncpa [#allocation4], 1 }

</bundles_post_ra>
